<compile_context>
chip_gen: v7x
topology: tpu7x:2x2x1
jax: 0.10.0
libtpu: 0.0.40
codegen_flags: <defaults>
</compile_context>

<pallas_src>
import functools

import jax
import jax.numpy as jnp
import numpy as np
from jax.experimental import pallas as pl
from jax.experimental.pallas import tpu as pltpu


def _ls_ce_kernel(logits_ref, targets_ref, out_ref, *, alpha, n_rows, tm, n_classes):
    i = pl.program_id(0)
    num_tiles = pl.num_programs(0)

    @pl.when(i == 0)
    def _():
        out_ref[...] = jnp.zeros_like(out_ref)

    x = logits_ref[...].astype(jnp.float32)          # (TM, C)
    t = targets_ref[...]                             # (TM, 1) int32

    # Mask rows past the true batch size (partial last tile).  Zero the inputs
    # first so garbage in the out-of-bounds region cannot produce NaN/Inf.
    row_ids = i * tm + jax.lax.broadcasted_iota(jnp.int32, (tm, 1), 0)
    row_mask = row_ids < n_rows                      # (TM, 1) bool
    x = jnp.where(row_mask, x, 0.0)

    # Numerically-stable logsumexp over the class (lane) axis.
    m = jnp.max(x, axis=-1, keepdims=True)
    shifted = x - m
    lse = jnp.log(jnp.sum(jnp.exp(shifted), axis=-1, keepdims=True))   # (TM, 1)

    # Fused reduction:
    #   loss_row = (1-a)*nll + a*smooth
    #            = lse - sum(shifted * [(1-a)*onehot + a/C])
    # (the weights sum to 1, so the -lse terms collapse into a single lse).
    class_ids = jax.lax.broadcasted_iota(jnp.int32, (tm, n_classes), 1)
    onehot = (class_ids == t).astype(jnp.float32)                       # (TM, C)
    w = (alpha / n_classes) + (1.0 - alpha) * onehot
    s = jnp.sum(shifted * w, axis=-1, keepdims=True)                    # (TM, 1)

    loss = jnp.where(row_mask, lse - s, 0.0)                            # (TM, 1)
    out_ref[...] += jnp.sum(loss, axis=0, keepdims=True)                # (1, 1)

    @pl.when(i == num_tiles - 1)
    def _():
        out_ref[...] = out_ref[...] * (1.0 / n_rows)


def label_smoothing_cross_entropy(logits, targets, alpha=0.1):
    """Pallas equivalent of LabelSmoothingCrossEntropy.forward (scalar loss)."""
    n, c = logits.shape
    targets2d = targets.reshape(n, 1).astype(jnp.int32)
    itemsize = jnp.dtype(logits.dtype).itemsize

    # Row tile: multiple of 8 sublanes, sized so a double-buffered logits tile
    # stays around a few MiB of VMEM (small tiles cap HBM bandwidth at ~30%,
    # 512+ rows reach ~85% of roofline).  Fits v5e/v6e/v7x scoped budgets.
    budget_bytes = 4 * 1024 * 1024                       # per logits buffer
    tm = max(8, min(1024, budget_bytes // max(1, c * itemsize)))
    tm = max(8, (tm // 8) * 8)
    if tm >= n:
        tm = n                                           # single full-extent tile
    grid = (pl.cdiv(n, tm),)

    kernel = functools.partial(
        _ls_ce_kernel, alpha=float(alpha), n_rows=n, tm=tm, n_classes=c)

    tile_bytes = tm * c * itemsize
    vmem_limit = int(min(96 * 1024 * 1024,
                         max(16 * 1024 * 1024, 4 * tile_bytes + (2 << 20))))

    cost = pl.CostEstimate(
        flops=6 * n * c,
        transcendentals=n * c,
        bytes_accessed=n * c * itemsize + n * 4 + 4,
    )

    out = pl.pallas_call(
        kernel,
        out_shape=jax.ShapeDtypeStruct((1, 1), jnp.float32),
        grid=grid,
        in_specs=[
            pl.BlockSpec((tm, c), lambda i: (i, 0)),
            pl.BlockSpec((tm, 1), lambda i: (i, 0)),
        ],
        out_specs=pl.BlockSpec((1, 1), lambda i: (0, 0)),
        compiler_params=pltpu.CompilerParams(
            dimension_semantics=("arbitrary",),
            vmem_limit_bytes=vmem_limit,
        ),
        cost_estimate=cost,
    )(logits, targets2d)
    return out[0, 0]


def _reference(logits, targets, alpha=0.1):
    # Pure-JAX reference mirroring the PyTorch forward exactly.
    log_preds = jax.nn.log_softmax(logits.astype(jnp.float32), axis=-1)
    nll = -jnp.take_along_axis(log_preds, targets[:, None].astype(jnp.int32),
                               axis=-1)[:, 0]
    smooth = -jnp.mean(log_preds, axis=-1)
    loss = (1.0 - alpha) * nll + alpha * smooth
    return jnp.mean(loss)


if __name__ == "__main__":
    alpha = 0.1
    key = jax.random.PRNGKey(0)

    # Case 1: module's native small shape (batch=8, num_classes=8), single tile.
    k1, k2, k3, k4 = jax.random.split(key, 4)
    logits = jax.random.normal(k1, (8, 8), dtype=jnp.float32)
    targets = jax.random.randint(k2, (8,), 0, 8, dtype=jnp.int32)
    loss = jax.block_until_ready(label_smoothing_cross_entropy(logits, targets, alpha))
    ref = jax.block_until_ready(_reference(logits, targets, alpha))
    assert np.allclose(np.asarray(loss), np.asarray(ref), rtol=1e-5, atol=1e-5), (loss, ref)

    # Case 2: exercises the row grid + masked partial last tile (N % TM != 0).
    logits2 = jax.random.normal(k3, (2050, 8), dtype=jnp.float32)
    targets2 = jax.random.randint(k4, (2050,), 0, 8, dtype=jnp.int32)
    loss2 = jax.block_until_ready(label_smoothing_cross_entropy(logits2, targets2, alpha))
    ref2 = jax.block_until_ready(_reference(logits2, targets2, alpha))
    assert np.allclose(np.asarray(loss2), np.asarray(ref2), rtol=1e-5, atol=1e-5), (loss2, ref2)

    print("KERNEL_OK")
</pallas_src>

<mosaic_0001>
module attributes {stable_mosaic.version = 11 : i64} {
  func.func @_ls_ce_kernel(%arg0: i32, %arg1: memref<8x8xf32, #tpu.memory_space<vmem>>, %arg2: memref<8x1xi32, #tpu.memory_space<vmem>>, %arg3: memref<1x1xf32, #tpu.memory_space<vmem>>) attributes {dimension_semantics = [#tpu.dimension_semantics<arbitrary>], iteration_bounds = array<i64: 1>, scalar_prefetch = 0 : i64, scratch_operands = 0 : i64, tpu.core_type = #tpu.core_type<tc>, window_params = [{transform_indices = @transform_0, window_bounds = array<i64: 8, 8>}, {transform_indices = @transform_1, window_bounds = array<i64: 8, 1>}, {pipeline_mode = #tpu.pipeline_mode<synchronous>, transform_indices = @transform_2, window_bounds = array<i64: 1, 1>}]} {
    %c0_i32 = arith.constant 0 : i32
    %0 = arith.cmpi eq, %arg0, %c0_i32 : i32
    %1 = arith.extui %0 : i1 to i32
    %c0_i32_0 = arith.constant 0 : i32
    %2 = arith.cmpi ne, %1, %c0_i32_0 : i32
    scf.if %2 {
      %cst_18 = arith.constant 0.000000e+00 : f32
      %46 = vector.broadcast %cst_18 : f32 to vector<1x1xf32>
      %c0_19 = arith.constant 0 : index
      %c0_20 = arith.constant 0 : index
      %47 = vector.load %arg3[%c0_19, %c0_20] : memref<1x1xf32, #tpu.memory_space<vmem>>, vector<1x1xf32>
      tpu.vector_store %arg3[%c0_19, %c0_20], %46 {strides = array<i32>} : memref<1x1xf32, #tpu.memory_space<vmem>>, vector<1x1xf32>,
    } else {
    }
    %c0 = arith.constant 0 : index
    %c0_1 = arith.constant 0 : index
    %3 = vector.load %arg1[%c0, %c0_1] : memref<8x8xf32, #tpu.memory_space<vmem>>, vector<8x8xf32>
    %c0_2 = arith.constant 0 : index
    %c0_3 = arith.constant 0 : index
    %4 = vector.load %arg2[%c0_2, %c0_3] : memref<8x1xi32, #tpu.memory_space<vmem>>, vector<8x1xi32>
    %c8_i32 = arith.constant 8 : i32
    %5 = arith.muli %arg0, %c8_i32 : i32
    %6 = tpu.iota {dimensions = array<i32: 0>} : vector<8x1xi32>
    %7 = vector.broadcast %5 : i32 to vector<8x1xi32>
    %8 = arith.addi %7, %6 : vector<8x1xi32>
    %c8_i32_4 = arith.constant 8 : i32
    %9 = vector.broadcast %c8_i32_4 : i32 to vector<8x1xi32>
    %10 = arith.cmpi slt, %8, %9 : vector<8x1xi32>
    %cst = arith.constant 0.000000e+00 : f32
    %11 = vector.shape_cast %10 : vector<8x1xi1> to vector<8x1xi1>
    %12 = vector.broadcast %11 : vector<8x1xi1> to vector<8x8xi1>
    %13 = vector.broadcast %cst : f32 to vector<8x8xf32>
    %14 = arith.select %12, %3, %13 : vector<8x8xi1>, vector<8x8xf32>
    %cst_5 = arith.constant dense<0xFF800000> : vector<8xf32>
    %15 = vector.multi_reduction <maximumf>, %14, %cst_5 [1] : vector<8x8xf32> to vector<8xf32>
    %16 = vector.shape_cast %15 : vector<8xf32> to vector<8x1xf32>
    %17 = vector.broadcast %16 : vector<8x1xf32> to vector<8x8xf32>
    %18 = arith.subf %14, %17 : vector<8x8xf32>
    %19 = math.exp %18 : vector<8x8xf32>
    %cst_6 = arith.constant dense<0.000000e+00> : vector<8xf32>
    %20 = vector.multi_reduction <add>, %19, %cst_6 [1] : vector<8x8xf32> to vector<8xf32>
    %21 = vector.shape_cast %20 : vector<8xf32> to vector<8x1xf32>
    %22 = math.log %21 : vector<8x1xf32>
    %23 = tpu.iota {dimensions = array<i32: 1>} : vector<8x8xi32>
    %24 = vector.broadcast %4 : vector<8x1xi32> to vector<8x8xi32>
    %25 = arith.cmpi eq, %23, %24 : vector<8x8xi32>
    %26 = arith.extui %25 : vector<8x8xi1> to vector<8x8xi32>
    %27 = arith.sitofp %26 : vector<8x8xi32> to vector<8x8xf32>
    %cst_7 = arith.constant 0.899999976 : f32
    %28 = vector.broadcast %cst_7 : f32 to vector<8x8xf32>
    %29 = arith.mulf %28, %27 : vector<8x8xf32>
    %cst_8 = arith.constant 1.250000e-02 : f32
    %30 = vector.broadcast %cst_8 : f32 to vector<8x8xf32>
    %31 = arith.addf %30, %29 : vector<8x8xf32>
    %32 = arith.mulf %18, %31 : vector<8x8xf32>
    %cst_9 = arith.constant dense<0.000000e+00> : vector<8xf32>
    %33 = vector.multi_reduction <add>, %32, %cst_9 [1] : vector<8x8xf32> to vector<8xf32>
    %34 = vector.shape_cast %33 : vector<8xf32> to vector<8x1xf32>
    %35 = arith.subf %22, %34 : vector<8x1xf32>
    %cst_10 = arith.constant 0.000000e+00 : f32
    %36 = vector.broadcast %cst_10 : f32 to vector<8x1xf32>
    %37 = arith.select %10, %35, %36 : vector<8x1xi1>, vector<8x1xf32>
    %c0_11 = arith.constant 0 : index
    %c0_12 = arith.constant 0 : index
    %38 = vector.load %arg3[%c0_11, %c0_12] : memref<1x1xf32, #tpu.memory_space<vmem>>, vector<1x1xf32>
    %cst_13 = arith.constant dense<0.000000e+00> : vector<1xf32>
    %39 = vector.multi_reduction <add>, %37, %cst_13 [0] : vector<8x1xf32> to vector<1xf32>
    %40 = vector.shape_cast %39 : vector<1xf32> to vector<1x1xf32>
    %41 = arith.addf %38, %40 : vector<1x1xf32>
    %c0_14 = arith.constant 0 : index
    %c0_15 = arith.constant 0 : index
    %42 = vector.load %arg3[%c0_14, %c0_15] : memref<1x1xf32, #tpu.memory_space<vmem>>, vector<1x1xf32>
    tpu.vector_store %arg3[%c0_14, %c0_15], %41 {strides = array<i32>} : memref<1x1xf32, #tpu.memory_space<vmem>>, vector<1x1xf32>,
    %c0_i32_16 = arith.constant 0 : i32
    %43 = arith.cmpi eq, %arg0, %c0_i32_16 : i32
    %44 = arith.extui %43 : i1 to i32
    %c0_i32_17 = arith.constant 0 : i32
    %45 = arith.cmpi ne, %44, %c0_i32_17 : i32
    scf.if %45 {
      %c0_18 = arith.constant 0 : index
      %c0_19 = arith.constant 0 : index
      %46 = vector.load %arg3[%c0_18, %c0_19] : memref<1x1xf32, #tpu.memory_space<vmem>>, vector<1x1xf32>
      %cst_20 = arith.constant 1.250000e-01 : f32
      %47 = vector.broadcast %cst_20 : f32 to vector<1x1xf32>
      %48 = arith.mulf %46, %47 : vector<1x1xf32>
      %c0_21 = arith.constant 0 : index
      %c0_22 = arith.constant 0 : index
      %49 = vector.load %arg3[%c0_21, %c0_22] : memref<1x1xf32, #tpu.memory_space<vmem>>, vector<1x1xf32>
      tpu.vector_store %arg3[%c0_21, %c0_22], %48 {strides = array<i32>} : memref<1x1xf32, #tpu.memory_space<vmem>>, vector<1x1xf32>,
    } else {
    }
    return
  }
  func.func @transform_0(%arg0: i32) -> (i32, i32) {
    %c0_i32 = arith.constant 0 : i32
    %c0_i32_0 = arith.constant 0 : i32
    return %arg0, %c0_i32 : i32, i32
  }
  func.func @transform_1(%arg0: i32) -> (i32, i32) {
    %c0_i32 = arith.constant 0 : i32
    %c0_i32_0 = arith.constant 0 : i32
    return %arg0, %c0_i32 : i32, i32
  }
  func.func @transform_2(%arg0: i32) -> (i32, i32) {
    %c0_i32 = arith.constant 0 : i32
    %c0_i32_0 = arith.constant 0 : i32
    %c0_i32_1 = arith.constant 0 : i32
    return %c0_i32, %c0_i32_0 : i32, i32
  }
}

</mosaic_0001>

<bundles_post_ra>
// kernel: tpu_custom_call.1
= control target key start
LH: loop header
LB: loop body
LE: loop exit
PB: predicated region body
PF: predicated region fallthrough
CT: control target
= control target key end

     0   :  { %vm29_vm0 = vcmask 64512   ;;  %s162_s0 = inlined_call_operand.vmem [shape: f32[8,8], index: 0, kind: input, shape index: {}]   ;;  %s163_s1 = inlined_call_operand.vmem [shape: s32[8,1], index: 1, kind: input, shape index: {}]   ;;  %s164_s2 = inlined_call_operand.hbm [shape: f32[1,1], index: 2, kind: output, shape index: {}]  }
   0x1   :  { %v18_v0 = vld [vmem:[%s162_s0] sm:$0xff] }
   0x2   :  { %7 = vsyncpa [#allocation3], 0  ;;  %v30_v1 = vsel %vm29_vm0, %v18_v0, -inf  ;;  %v120_v2 = vmov 0   ;;  %v19_v3 = vld [vmem:[%s163_s1] sm:$0xff]  ;;  %vm16_vm1 = vcmask 0   ;;  %v41_v7 = vlaneseq }
   0x3   :  { %91 = vset.pattern.permute.xlu0 %v120_v2  ;;  %v121_v4 = vmov 0.0   ;;  %s122_s0 = smov [#allocation2]  }
   0x4   :  { %31 = vmax.xlane.f32.xlu0 %v30_v1  ;;  %17 = vst.msk [vmem:[#allocation2] sm:$0x1] %vm16_vm1, %v121_v4  ;;  %v42_v9 = vand.u32 127, %v41_v7  ;;  %s79_s1 = sshll.u32 %s122_s0, 4  ;;  %s80_s1 = int_to_ptr.vmem [resolvable:$true] %s79_s1 }
   0x5   :  { %s96_s13 = scalar_lea.vmem %s80_s1, 16  ;;  %s100_s14 = scalar_lea.vmem %s80_s1, 32 }
   0x6   :  { %p97_p0 = scmp.ne.s32.totalorder %s80_s1, %s96_s13  ;;  %p101_p1 = scmp.lt.s32.totalorder %s80_s1, %s80_s1 }
   0x7   :  { %p102_p2 = scmp.lt.s32.totalorder %s100_s14, %s96_s13 }
   0x9   :  { %p103_p3 = por %p102_p2, %p101_p1 }
   0xb   :  { %v57_v28 = vld [vmem:[#allocation2] sm:$0x1]  ;;  %p104_p4 = pnand %p103_p3, %p97_p0 }
  0x1a   :  { %44 = vperm.xlu0 %91, %v19_v3  }
  0x91   :  { %v32_v5 = vpop.xlane.xlu0 %31 }
  0x92   :  { %v33_v6 = vsub.f32 %v18_v0, %v32_v5 }
  0x94   :  { %v34_v8 = vmul.f32 1.442695, %v33_v6 }
  0x96   :  { %92 = vpow2.f32 %v34_v8 }
  0x99   :  { %v45_v10 = vpop.permute.xlu0 %44 }
  0x9a   :  { %vm46_vm2 = vcmp.eq.s32.totalorder %v42_v9, %v45_v10 }
  0x9b   :  { %v87_v11 = vsel %vm46_vm2, 1.0, %v121_v4 }
  0x9c   :  { %v49_v12 = vmul.f32 0.9, %v87_v11 }
  0x9e   :  { %v50_v13 = vadd.f32 0.0125, %v49_v12 }
  0xa0   :  { %v93_v14 = vpop.eup %92  ;;  %v51_v16 = vmul.f32 %v50_v13, %v33_v6 }
  0xa1   :  { %v36_v15 = vsel %vm29_vm0, %v93_v14, 0.0 }
  0xa2   :  { %37 = vadd.xlane.f32.xlu1 %v36_v15  ;;  %v52_v17 = vsel %vm29_vm0, %v51_v16, 0.0 }
  0xa6   :  { %53 = vadd.xlane.f32.xlu1 %v52_v17 }
 0x12f   :  { %v38_v18 = vpop.xlane.xlu1 %37 }
 0x130   :  { %94 = vlog2.f32 %v38_v18 }
 0x133   :  { %v54_v21 = vpop.xlane.xlu1 %53 }
 0x13a   :  { %v95_v19 = vpop.eup %94 }
 0x13b   :  { %v40_v20 = vmul.f32 0.6931472, %v95_v19 }
 0x13d   :  { %v55_v22 = vsub.f32 %v40_v20, %v54_v21 }
 0x13f   :  { %v58_v23 = vrot.slane %v55_v22, 4 }
 0x141   :  { %v59_v24 = vadd.f32 %v58_v23, %v55_v22 }
 0x143   :  { %v60_v25 = vrot.slane %v59_v24, 2 }
 0x145   :  { %v61_v26 = vadd.f32 %v60_v25, %v59_v24 }
 0x147   :  { %v62_v27 = vrot.slane %v61_v26, 1 }
 0x149   :  { %v63_v29 = vadd.f32 %v62_v27, %v61_v26 }
 0x14b   :  { %v64_v30 = vadd.f32 %v63_v29, %v57_v28 }
 0x14d   :  { %66 = vst.msk [vmem:[#allocation2] sm:$0x1] %vm16_vm1, %v64_v30 }
 0x154   :  { %v70_v31 = vld [vmem:[#allocation2] sm:$0x1] }
 0x155   :  { %v71_v32 = vmul.f32 0.125, %v70_v31 }
 0x157   :  { %72 = vst.msk [vmem:[#allocation2] sm:$0x1] %vm16_vm1, %v71_v32 }
 0x158   :  { %107 = shalt.err (!%p104_p4)
}
 0x159   :  { %s108_s17 = scalar_lea.hbm %s164_s2, 16 }
 0x15a   :  { %p109_p5 = scmp.ne.s32.totalorder %s164_s2, %s108_s17  ;;  %p112_p6 = scmp.lt.u32.totalorder %s108_s17, %s164_s2 }
 0x15c   :  { %p114_p7 = pnand %p112_p6, %p109_p5 }
 0x15e   :  { %117 = shalt.err (!%p114_p7)
}
 0x15f   :  { %82 = dma.vmem_to_hbm [thread:$0]  %s80_s1, 16, %s164_s2, [#allocation3]  }
 0x160   :  { %118 = dma.done.wait [#allocation3], 16  }
 0x161   :  { %119 = vsyncadd [#allocation3], 4294967280 }
 0x162   :  { %86 = vsyncpa [#allocation3], 1 }

</bundles_post_ra>
